<compile_context>
chip_gen: v7x
topology: tpu7x:2x2x1
jax: 0.10.0
libtpu: 0.0.40
codegen_flags: <defaults>
</compile_context>

<pallas_src>
import numpy as np
import jax
import jax.numpy as jnp
from jax.experimental import pallas as pl
from jax.experimental.pallas import tpu as pltpu

# ----- synthetic, deterministic configuration -----
VOCAB = 33              # dataset.PAD_TOKEN_VALUE + 1  (PAD = 32)
PAD_TOKEN = VOCAB - 1
E = 16                  # embedding_dim
H = 32                  # lstm_output_dim
L1 = 24                 # extra_non_linear
C = 5                   # num_classes
B = 2                   # number of trees in the batch
DEPTH = 3               # complete binary tree depth
NPG = 2 ** DEPTH - 1    # nodes per graph = 7
N = B * NPG             # total nodes in the batched graph = 14

# rows per level (level 0 = roots ... DEPTH-1 = leaves), batched over trees
LEVEL_ROWS = [B * (1 << l) for l in range(DEPTH)]          # [2, 4, 8]
# x_vec layout is leaves-first: offset of each level's block of rows
LEVEL_OFF = {}
_off = 0
for _l in range(DEPTH - 1, -1, -1):
    LEVEL_OFF[_l] = _off
    _off += LEVEL_ROWS[_l]
assert _off == N
N_PAD = ((N + 7) // 8) * 8                                 # sublane-pad to 16


def tree_lstm_kernel(x_ref, wi_ref, wo_ref, wu_ref,
                     ui_ref, uo_ref, uu_ref,
                     bi_ref, bo_ref, bu_ref,
                     uf_ref, bf_ref,
                     w1_ref, b1_ref, w2_ref, b2_ref,
                     out_ref):
    f32 = jnp.float32
    x = x_ref[...]                                            # (N_PAD, E)

    # W_iou(x) for every node of every tree, one MXU matmul per gate.
    wi_x = jnp.dot(x, wi_ref[...], preferred_element_type=f32)   # (N_PAD, H)
    wo_x = jnp.dot(x, wo_ref[...], preferred_element_type=f32)
    wu_x = jnp.dot(x, wu_ref[...], preferred_element_type=f32)

    h_prev = None   # h of the previously processed (child) level: (2*rows, H)
    c_prev = None
    # Level-by-level, leaves -> root. Static Python unroll: DEPTH dependent
    # steps instead of N serial one-row matvecs.
    for lvl in range(DEPTH - 1, -1, -1):
        rows = LEVEL_ROWS[lvl]
        off = LEVEL_OFF[lvl]
        gi = wi_x[off:off + rows, :] + bi_ref[...]
        go = wo_x[off:off + rows, :] + bo_ref[...]
        gu = wu_x[off:off + rows, :] + bu_ref[...]
        if h_prev is None:
            # leaves: DGL never runs reduce_func -> no child contributions
            c_new = jax.nn.sigmoid(gi) * jnp.tanh(gu)
        else:
            # children of parent-row q are child-rows q (left) and rows+q (right)
            f = jax.nn.sigmoid(
                jnp.dot(h_prev, uf_ref[...], preferred_element_type=f32)
                + bf_ref[...])                                # (2*rows, H)
            fc = f * c_prev
            h_tild = h_prev[:rows, :] + h_prev[rows:, :]      # sum(mailbox['h'], 1)
            c_red = fc[:rows, :] + fc[rows:, :]               # sum(f * mailbox['c'], 1)
            gi = gi + jnp.dot(h_tild, ui_ref[...], preferred_element_type=f32)
            go = go + jnp.dot(h_tild, uo_ref[...], preferred_element_type=f32)
            gu = gu + jnp.dot(h_tild, uu_ref[...], preferred_element_type=f32)
            c_new = jax.nn.sigmoid(gi) * jnp.tanh(gu) + c_red
        h_prev = jax.nn.sigmoid(go) * jnp.tanh(c_new)
        c_prev = c_new

    # h_prev is the root h of each tree, already in batch order: fused fc head
    # Linear(H, L1) -> Tanh -> Linear(L1, C)
    hid = jnp.tanh(jnp.dot(h_prev, w1_ref[...], preferred_element_type=f32)
                   + b1_ref[...])
    out_ref[...] = (jnp.dot(hid, w2_ref[...], preferred_element_type=f32)
                    + b2_ref[...])


def tree_lstm_forward(x_vec, p):
    vmem = pl.BlockSpec(memory_space=pltpu.MemorySpace.VMEM)
    return pl.pallas_call(
        tree_lstm_kernel,
        out_shape=jax.ShapeDtypeStruct((B, C), jnp.float32),
        in_specs=[vmem] * 16,
        out_specs=vmem,
    )(x_vec,
      p["W_i"], p["W_o"], p["W_u"],
      p["U_i"], p["U_o"], p["U_u"],
      p["b_i"], p["b_o"], p["b_u"],
      p["U_f"], p["b_f"],
      p["W1"], p["b1"], p["W2"], p["b2"])


def init_params(key):
    ks = jax.random.split(key, 16)

    def uni(k, shape, fan_in):
        b = 1.0 / np.sqrt(fan_in)
        return jax.random.uniform(k, shape, jnp.float32, -b, b)

    emb = jax.random.normal(ks[0], (VOCAB, E), jnp.float32)
    emb = emb.at[PAD_TOKEN].set(0.0)                 # padding_idx row = 0
    return {
        "emb": emb,
        # W_iou / U_iou split per gate (i, o, u) so each output is lane-0 aligned
        "W_i": uni(ks[1], (E, H), E), "W_o": uni(ks[2], (E, H), E), "W_u": uni(ks[3], (E, H), E),
        "U_i": uni(ks[4], (H, H), H), "U_o": uni(ks[5], (H, H), H), "U_u": uni(ks[6], (H, H), H),
        "b_i": jnp.zeros((1, H), jnp.float32),
        "b_o": jnp.zeros((1, H), jnp.float32),
        "b_u": jnp.zeros((1, H), jnp.float32),
        "U_f": uni(ks[7], (H, H), H), "b_f": uni(ks[8], (1, H), H),
        "W1": uni(ks[9], (H, L1), H), "b1": uni(ks[10], (1, L1), H),
        "W2": uni(ks[11], (L1, C), L1), "b2": uni(ks[12], (1, C), L1),
        "tok_key": ks[13],
    }


def build_level_perm():
    """Global node index for each kernel row.

    Rows are level-major (leaves first, roots last) and, within a level,
    sibling-split: the first half are left children of the parent level's rows
    (in parent-row order), the second half are the right children. This makes
    every child gather in the kernel a pair of contiguous static slices.
    """
    rowmaps = [np.arange(B, dtype=np.int64) * NPG]            # level 0: roots
    for _ in range(1, DEPTH):
        parents = rowmaps[-1]
        tree, heap = parents // NPG, parents % NPG
        rowmaps.append(np.concatenate([tree * NPG + 2 * heap + 1,    # left kids
                                       tree * NPG + 2 * heap + 2]))  # right kids
    return np.concatenate(rowmaps[::-1])                      # leaves ... roots


def ref_forward(tokens, p):
    """Pure numpy reference mirroring the PyTorch/DGL per-node semantics."""
    sig = lambda z: 1.0 / (1.0 + np.exp(-z))
    emb = np.asarray(p["emb"], np.float64)
    Wi, Wo, Wu = (np.asarray(p[k], np.float64) for k in ("W_i", "W_o", "W_u"))
    Ui, Uo, Uu = (np.asarray(p[k], np.float64) for k in ("U_i", "U_o", "U_u"))
    bi, bo, bu = (np.asarray(p[k], np.float64)[0] for k in ("b_i", "b_o", "b_u"))
    Uf = np.asarray(p["U_f"], np.float64); bf = np.asarray(p["b_f"], np.float64)[0]
    W1 = np.asarray(p["W1"], np.float64); b1 = np.asarray(p["b1"], np.float64)[0]
    W2 = np.asarray(p["W2"], np.float64); b2 = np.asarray(p["b2"], np.float64)[0]
    tok = np.asarray(tokens).reshape(-1)
    xv = emb[tok]                                             # (N, E)
    h = np.zeros((N, H)); c = np.zeros((N, H))
    for g in range(B):
        for i in reversed(range(NPG)):                        # leaves -> root
            n = g * NPG + i
            kids = [g * NPG + ch for ch in (2 * i + 1, 2 * i + 2) if ch < NPG]
            h_tild = np.zeros(H); c_red = np.zeros(H)
            for k in kids:
                h_tild += h[k]
                c_red += sig(h[k] @ Uf + bf) * c[k]
            gi = xv[n] @ Wi + h_tild @ Ui + bi
            go = xv[n] @ Wo + h_tild @ Uo + bo
            gu = xv[n] @ Wu + h_tild @ Uu + bu
            c[n] = sig(gi) * np.tanh(gu) + c_red
            h[n] = sig(go) * np.tanh(c[n])
    roots = h[[g * NPG for g in range(B)]]
    return np.tanh(roots @ W1 + b1) @ W2 + b2


if __name__ == "__main__":
    params = init_params(jax.random.PRNGKey(0))
    tokens = jax.random.randint(params["tok_key"], (B, NPG), 0, VOCAB - 1)

    # glue: embedding lookup (gather) + level-major permutation stay in plain JAX
    x_flat = params["emb"][tokens.reshape(-1)]                # (N, E)
    perm = build_level_perm()
    x_lvl = x_flat[jnp.asarray(perm)]                         # (N, E) level-major
    x_lvl = jnp.concatenate(
        [x_lvl, jnp.zeros((N_PAD - N, E), jnp.float32)], axis=0)   # (N_PAD, E)

    out = tree_lstm_forward(x_lvl, params)
    out = jax.block_until_ready(out)

    ref = ref_forward(tokens, params)
    np.testing.assert_allclose(np.asarray(out), ref, rtol=1e-4, atol=1e-4)
    print("KERNEL_OK")
</pallas_src>

<mosaic_0001>
module attributes {stable_mosaic.version = 11 : i64} {
  func.func @tree_lstm_kernel(%arg0: memref<16x16xf32, #tpu.memory_space<vmem>>, %arg1: memref<16x32xf32, #tpu.memory_space<vmem>>, %arg2: memref<16x32xf32, #tpu.memory_space<vmem>>, %arg3: memref<16x32xf32, #tpu.memory_space<vmem>>, %arg4: memref<32x32xf32, #tpu.memory_space<vmem>>, %arg5: memref<32x32xf32, #tpu.memory_space<vmem>>, %arg6: memref<32x32xf32, #tpu.memory_space<vmem>>, %arg7: memref<1x32xf32, #tpu.memory_space<vmem>>, %arg8: memref<1x32xf32, #tpu.memory_space<vmem>>, %arg9: memref<1x32xf32, #tpu.memory_space<vmem>>, %arg10: memref<32x32xf32, #tpu.memory_space<vmem>>, %arg11: memref<1x32xf32, #tpu.memory_space<vmem>>, %arg12: memref<32x24xf32, #tpu.memory_space<vmem>>, %arg13: memref<1x24xf32, #tpu.memory_space<vmem>>, %arg14: memref<24x5xf32, #tpu.memory_space<vmem>>, %arg15: memref<1x5xf32, #tpu.memory_space<vmem>>, %arg16: memref<2x5xf32, #tpu.memory_space<vmem>>) attributes {dimension_semantics = [], scalar_prefetch = 0 : i64, scratch_operands = 0 : i64, tpu.core_type = #tpu.core_type<tc>} {
    %c0 = arith.constant 0 : index
    %c0_0 = arith.constant 0 : index
    %0 = vector.load %arg0[%c0, %c0_0] : memref<16x16xf32, #tpu.memory_space<vmem>>, vector<16x16xf32>
    %c0_1 = arith.constant 0 : index
    %c0_2 = arith.constant 0 : index
    %1 = vector.load %arg1[%c0_1, %c0_2] : memref<16x32xf32, #tpu.memory_space<vmem>>, vector<16x32xf32>
    %cst = arith.constant dense<0.000000e+00> : vector<16x32xf32>
    %2 = tpu.matmul %0, %1, %cst {dimension_numbers = #tpu.dot_dimension_numbers<[1], [0], [0], [1], [0, 0, 1, 1], [], []>} : vector<16x16xf32>, vector<16x32xf32>, vector<16x32xf32> -> vector<16x32xf32>
    %c0_3 = arith.constant 0 : index
    %c0_4 = arith.constant 0 : index
    %3 = vector.load %arg2[%c0_3, %c0_4] : memref<16x32xf32, #tpu.memory_space<vmem>>, vector<16x32xf32>
    %cst_5 = arith.constant dense<0.000000e+00> : vector<16x32xf32>
    %4 = tpu.matmul %0, %3, %cst_5 {dimension_numbers = #tpu.dot_dimension_numbers<[1], [0], [0], [1], [0, 0, 1, 1], [], []>} : vector<16x16xf32>, vector<16x32xf32>, vector<16x32xf32> -> vector<16x32xf32>
    %c0_6 = arith.constant 0 : index
    %c0_7 = arith.constant 0 : index
    %5 = vector.load %arg3[%c0_6, %c0_7] : memref<16x32xf32, #tpu.memory_space<vmem>>, vector<16x32xf32>
    %cst_8 = arith.constant dense<0.000000e+00> : vector<16x32xf32>
    %6 = tpu.matmul %0, %5, %cst_8 {dimension_numbers = #tpu.dot_dimension_numbers<[1], [0], [0], [1], [0, 0, 1, 1], [], []>} : vector<16x16xf32>, vector<16x32xf32>, vector<16x32xf32> -> vector<16x32xf32>
    %7 = vector.extract_strided_slice %2 {offsets = [0, 0], sizes = [8, 32], strides = [1, 1]} : vector<16x32xf32> to vector<8x32xf32>
    %c0_9 = arith.constant 0 : index
    %c0_10 = arith.constant 0 : index
    %8 = vector.load %arg7[%c0_9, %c0_10] : memref<1x32xf32, #tpu.memory_space<vmem>>, vector<1x32xf32>
    %9 = vector.broadcast %8 : vector<1x32xf32> to vector<8x32xf32>
    %10 = arith.addf %7, %9 : vector<8x32xf32>
    %11 = vector.extract_strided_slice %4 {offsets = [0, 0], sizes = [8, 32], strides = [1, 1]} : vector<16x32xf32> to vector<8x32xf32>
    %c0_11 = arith.constant 0 : index
    %c0_12 = arith.constant 0 : index
    %12 = vector.load %arg8[%c0_11, %c0_12] : memref<1x32xf32, #tpu.memory_space<vmem>>, vector<1x32xf32>
    %13 = vector.broadcast %12 : vector<1x32xf32> to vector<8x32xf32>
    %14 = arith.addf %11, %13 : vector<8x32xf32>
    %15 = vector.extract_strided_slice %6 {offsets = [0, 0], sizes = [8, 32], strides = [1, 1]} : vector<16x32xf32> to vector<8x32xf32>
    %c0_13 = arith.constant 0 : index
    %c0_14 = arith.constant 0 : index
    %16 = vector.load %arg9[%c0_13, %c0_14] : memref<1x32xf32, #tpu.memory_space<vmem>>, vector<1x32xf32>
    %17 = vector.broadcast %16 : vector<1x32xf32> to vector<8x32xf32>
    %18 = arith.addf %15, %17 : vector<8x32xf32>
    %19 = arith.negf %10 : vector<8x32xf32>
    %20 = math.exp %19 : vector<8x32xf32>
    %cst_15 = arith.constant 1.000000e+00 : f32
    %21 = vector.broadcast %cst_15 : f32 to vector<8x32xf32>
    %22 = arith.addf %21, %20 : vector<8x32xf32>
    %23 = arith.divf %21, %22 : vector<8x32xf32>
    %24 = math.tanh %18 : vector<8x32xf32>
    %25 = arith.mulf %23, %24 : vector<8x32xf32>
    %26 = arith.negf %14 : vector<8x32xf32>
    %27 = math.exp %26 : vector<8x32xf32>
    %cst_16 = arith.constant 1.000000e+00 : f32
    %28 = vector.broadcast %cst_16 : f32 to vector<8x32xf32>
    %29 = arith.addf %28, %27 : vector<8x32xf32>
    %30 = arith.divf %28, %29 : vector<8x32xf32>
    %31 = math.tanh %25 : vector<8x32xf32>
    %32 = arith.mulf %30, %31 : vector<8x32xf32>
    %33 = vector.extract_strided_slice %2 {offsets = [8, 0], sizes = [4, 32], strides = [1, 1]} : vector<16x32xf32> to vector<4x32xf32>
    %c0_17 = arith.constant 0 : index
    %c0_18 = arith.constant 0 : index
    %34 = vector.load %arg7[%c0_17, %c0_18] : memref<1x32xf32, #tpu.memory_space<vmem>>, vector<1x32xf32>
    %35 = vector.broadcast %34 : vector<1x32xf32> to vector<4x32xf32>
    %36 = arith.addf %33, %35 : vector<4x32xf32>
    %37 = vector.extract_strided_slice %4 {offsets = [8, 0], sizes = [4, 32], strides = [1, 1]} : vector<16x32xf32> to vector<4x32xf32>
    %c0_19 = arith.constant 0 : index
    %c0_20 = arith.constant 0 : index
    %38 = vector.load %arg8[%c0_19, %c0_20] : memref<1x32xf32, #tpu.memory_space<vmem>>, vector<1x32xf32>
    %39 = vector.broadcast %38 : vector<1x32xf32> to vector<4x32xf32>
    %40 = arith.addf %37, %39 : vector<4x32xf32>
    %41 = vector.extract_strided_slice %6 {offsets = [8, 0], sizes = [4, 32], strides = [1, 1]} : vector<16x32xf32> to vector<4x32xf32>
    %c0_21 = arith.constant 0 : index
    %c0_22 = arith.constant 0 : index
    %42 = vector.load %arg9[%c0_21, %c0_22] : memref<1x32xf32, #tpu.memory_space<vmem>>, vector<1x32xf32>
    %43 = vector.broadcast %42 : vector<1x32xf32> to vector<4x32xf32>
    %44 = arith.addf %41, %43 : vector<4x32xf32>
    %c0_23 = arith.constant 0 : index
    %c0_24 = arith.constant 0 : index
    %45 = vector.load %arg10[%c0_23, %c0_24] : memref<32x32xf32, #tpu.memory_space<vmem>>, vector<32x32xf32>
    %cst_25 = arith.constant dense<0.000000e+00> : vector<8x32xf32>
    %46 = tpu.matmul %32, %45, %cst_25 {dimension_numbers = #tpu.dot_dimension_numbers<[1], [0], [0], [1], [0, 0, 1, 1], [], []>} : vector<8x32xf32>, vector<32x32xf32>, vector<8x32xf32> -> vector<8x32xf32>
    %c0_26 = arith.constant 0 : index
    %c0_27 = arith.constant 0 : index
    %47 = vector.load %arg11[%c0_26, %c0_27] : memref<1x32xf32, #tpu.memory_space<vmem>>, vector<1x32xf32>
    %48 = vector.broadcast %47 : vector<1x32xf32> to vector<8x32xf32>
    %49 = arith.addf %46, %48 : vector<8x32xf32>
    %50 = arith.negf %49 : vector<8x32xf32>
    %51 = math.exp %50 : vector<8x32xf32>
    %cst_28 = arith.constant 1.000000e+00 : f32
    %52 = vector.broadcast %cst_28 : f32 to vector<8x32xf32>
    %53 = arith.addf %52, %51 : vector<8x32xf32>
    %54 = arith.divf %52, %53 : vector<8x32xf32>
    %55 = arith.mulf %54, %25 : vector<8x32xf32>
    %56 = vector.extract_strided_slice %32 {offsets = [0, 0], sizes = [4, 32], strides = [1, 1]} : vector<8x32xf32> to vector<4x32xf32>
    %57 = vector.extract_strided_slice %32 {offsets = [4, 0], sizes = [4, 32], strides = [1, 1]} : vector<8x32xf32> to vector<4x32xf32>
    %58 = arith.addf %56, %57 : vector<4x32xf32>
    %59 = vector.extract_strided_slice %55 {offsets = [0, 0], sizes = [4, 32], strides = [1, 1]} : vector<8x32xf32> to vector<4x32xf32>
    %60 = vector.extract_strided_slice %55 {offsets = [4, 0], sizes = [4, 32], strides = [1, 1]} : vector<8x32xf32> to vector<4x32xf32>
    %61 = arith.addf %59, %60 : vector<4x32xf32>
    %c0_29 = arith.constant 0 : index
    %c0_30 = arith.constant 0 : index
    %62 = vector.load %arg4[%c0_29, %c0_30] : memref<32x32xf32, #tpu.memory_space<vmem>>, vector<32x32xf32>
    %cst_31 = arith.constant dense<0.000000e+00> : vector<4x32xf32>
    %63 = tpu.matmul %58, %62, %cst_31 {dimension_numbers = #tpu.dot_dimension_numbers<[1], [0], [0], [1], [0, 0, 1, 1], [], []>} : vector<4x32xf32>, vector<32x32xf32>, vector<4x32xf32> -> vector<4x32xf32>
    %64 = arith.addf %36, %63 : vector<4x32xf32>
    %c0_32 = arith.constant 0 : index
    %c0_33 = arith.constant 0 : index
    %65 = vector.load %arg5[%c0_32, %c0_33] : memref<32x32xf32, #tpu.memory_space<vmem>>, vector<32x32xf32>
    %cst_34 = arith.constant dense<0.000000e+00> : vector<4x32xf32>
    %66 = tpu.matmul %58, %65, %cst_34 {dimension_numbers = #tpu.dot_dimension_numbers<[1], [0], [0], [1], [0, 0, 1, 1], [], []>} : vector<4x32xf32>, vector<32x32xf32>, vector<4x32xf32> -> vector<4x32xf32>
    %67 = arith.addf %40, %66 : vector<4x32xf32>
    %c0_35 = arith.constant 0 : index
    %c0_36 = arith.constant 0 : index
    %68 = vector.load %arg6[%c0_35, %c0_36] : memref<32x32xf32, #tpu.memory_space<vmem>>, vector<32x32xf32>
    %cst_37 = arith.constant dense<0.000000e+00> : vector<4x32xf32>
    %69 = tpu.matmul %58, %68, %cst_37 {dimension_numbers = #tpu.dot_dimension_numbers<[1], [0], [0], [1], [0, 0, 1, 1], [], []>} : vector<4x32xf32>, vector<32x32xf32>, vector<4x32xf32> -> vector<4x32xf32>
    %70 = arith.addf %44, %69 : vector<4x32xf32>
    %71 = arith.negf %64 : vector<4x32xf32>
    %72 = math.exp %71 : vector<4x32xf32>
    %cst_38 = arith.constant 1.000000e+00 : f32
    %73 = vector.broadcast %cst_38 : f32 to vector<4x32xf32>
    %74 = arith.addf %73, %72 : vector<4x32xf32>
    %75 = arith.divf %73, %74 : vector<4x32xf32>
    %76 = math.tanh %70 : vector<4x32xf32>
    %77 = arith.mulf %75, %76 : vector<4x32xf32>
    %78 = arith.addf %77, %61 : vector<4x32xf32>
    %79 = arith.negf %67 : vector<4x32xf32>
    %80 = math.exp %79 : vector<4x32xf32>
    %cst_39 = arith.constant 1.000000e+00 : f32
    %81 = vector.broadcast %cst_39 : f32 to vector<4x32xf32>
    %82 = arith.addf %81, %80 : vector<4x32xf32>
    %83 = arith.divf %81, %82 : vector<4x32xf32>
    %84 = math.tanh %78 : vector<4x32xf32>
    %85 = arith.mulf %83, %84 : vector<4x32xf32>
    %86 = vector.extract_strided_slice %2 {offsets = [12, 0], sizes = [2, 32], strides = [1, 1]} : vector<16x32xf32> to vector<2x32xf32>
    %c0_40 = arith.constant 0 : index
    %c0_41 = arith.constant 0 : index
    %87 = vector.load %arg7[%c0_40, %c0_41] : memref<1x32xf32, #tpu.memory_space<vmem>>, vector<1x32xf32>
    %88 = vector.broadcast %87 : vector<1x32xf32> to vector<2x32xf32>
    %89 = arith.addf %86, %88 : vector<2x32xf32>
    %90 = vector.extract_strided_slice %4 {offsets = [12, 0], sizes = [2, 32], strides = [1, 1]} : vector<16x32xf32> to vector<2x32xf32>
    %c0_42 = arith.constant 0 : index
    %c0_43 = arith.constant 0 : index
    %91 = vector.load %arg8[%c0_42, %c0_43] : memref<1x32xf32, #tpu.memory_space<vmem>>, vector<1x32xf32>
    %92 = vector.broadcast %91 : vector<1x32xf32> to vector<2x32xf32>
    %93 = arith.addf %90, %92 : vector<2x32xf32>
    %94 = vector.extract_strided_slice %6 {offsets = [12, 0], sizes = [2, 32], strides = [1, 1]} : vector<16x32xf32> to vector<2x32xf32>
    %c0_44 = arith.constant 0 : index
    %c0_45 = arith.constant 0 : index
    %95 = vector.load %arg9[%c0_44, %c0_45] : memref<1x32xf32, #tpu.memory_space<vmem>>, vector<1x32xf32>
    %96 = vector.broadcast %95 : vector<1x32xf32> to vector<2x32xf32>
    %97 = arith.addf %94, %96 : vector<2x32xf32>
    %c0_46 = arith.constant 0 : index
    %c0_47 = arith.constant 0 : index
    %98 = vector.load %arg10[%c0_46, %c0_47] : memref<32x32xf32, #tpu.memory_space<vmem>>, vector<32x32xf32>
    %cst_48 = arith.constant dense<0.000000e+00> : vector<4x32xf32>
    %99 = tpu.matmul %85, %98, %cst_48 {dimension_numbers = #tpu.dot_dimension_numbers<[1], [0], [0], [1], [0, 0, 1, 1], [], []>} : vector<4x32xf32>, vector<32x32xf32>, vector<4x32xf32> -> vector<4x32xf32>
    %c0_49 = arith.constant 0 : index
    %c0_50 = arith.constant 0 : index
    %100 = vector.load %arg11[%c0_49, %c0_50] : memref<1x32xf32, #tpu.memory_space<vmem>>, vector<1x32xf32>
    %101 = vector.broadcast %100 : vector<1x32xf32> to vector<4x32xf32>
    %102 = arith.addf %99, %101 : vector<4x32xf32>
    %103 = arith.negf %102 : vector<4x32xf32>
    %104 = math.exp %103 : vector<4x32xf32>
    %cst_51 = arith.constant 1.000000e+00 : f32
    %105 = vector.broadcast %cst_51 : f32 to vector<4x32xf32>
    %106 = arith.addf %105, %104 : vector<4x32xf32>
    %107 = arith.divf %105, %106 : vector<4x32xf32>
    %108 = arith.mulf %107, %78 : vector<4x32xf32>
    %109 = vector.extract_strided_slice %85 {offsets = [0, 0], sizes = [2, 32], strides = [1, 1]} : vector<4x32xf32> to vector<2x32xf32>
    %110 = vector.extract_strided_slice %85 {offsets = [2, 0], sizes = [2, 32], strides = [1, 1]} : vector<4x32xf32> to vector<2x32xf32>
    %111 = arith.addf %109, %110 : vector<2x32xf32>
    %112 = vector.extract_strided_slice %108 {offsets = [0, 0], sizes = [2, 32], strides = [1, 1]} : vector<4x32xf32> to vector<2x32xf32>
    %113 = vector.extract_strided_slice %108 {offsets = [2, 0], sizes = [2, 32], strides = [1, 1]} : vector<4x32xf32> to vector<2x32xf32>
    %114 = arith.addf %112, %113 : vector<2x32xf32>
    %c0_52 = arith.constant 0 : index
    %c0_53 = arith.constant 0 : index
    %115 = vector.load %arg4[%c0_52, %c0_53] : memref<32x32xf32, #tpu.memory_space<vmem>>, vector<32x32xf32>
    %cst_54 = arith.constant dense<0.000000e+00> : vector<2x32xf32>
    %116 = tpu.matmul %111, %115, %cst_54 {dimension_numbers = #tpu.dot_dimension_numbers<[1], [0], [0], [1], [0, 0, 1, 1], [], []>} : vector<2x32xf32>, vector<32x32xf32>, vector<2x32xf32> -> vector<2x32xf32>
    %117 = arith.addf %89, %116 : vector<2x32xf32>
    %c0_55 = arith.constant 0 : index
    %c0_56 = arith.constant 0 : index
    %118 = vector.load %arg5[%c0_55, %c0_56] : memref<32x32xf32, #tpu.memory_space<vmem>>, vector<32x32xf32>
    %cst_57 = arith.constant dense<0.000000e+00> : vector<2x32xf32>
    %119 = tpu.matmul %111, %118, %cst_57 {dimension_numbers = #tpu.dot_dimension_numbers<[1], [0], [0], [1], [0, 0, 1, 1], [], []>} : vector<2x32xf32>, vector<32x32xf32>, vector<2x32xf32> -> vector<2x32xf32>
    %120 = arith.addf %93, %119 : vector<2x32xf32>
    %c0_58 = arith.constant 0 : index
    %c0_59 = arith.constant 0 : index
    %121 = vector.load %arg6[%c0_58, %c0_59] : memref<32x32xf32, #tpu.memory_space<vmem>>, vector<32x32xf32>
    %cst_60 = arith.constant dense<0.000000e+00> : vector<2x32xf32>
    %122 = tpu.matmul %111, %121, %cst_60 {dimension_numbers = #tpu.dot_dimension_numbers<[1], [0], [0], [1], [0, 0, 1, 1], [], []>} : vector<2x32xf32>, vector<32x32xf32>, vector<2x32xf32> -> vector<2x32xf32>
    %123 = arith.addf %97, %122 : vector<2x32xf32>
    %124 = arith.negf %117 : vector<2x32xf32>
    %125 = math.exp %124 : vector<2x32xf32>
    %cst_61 = arith.constant 1.000000e+00 : f32
    %126 = vector.broadcast %cst_61 : f32 to vector<2x32xf32>
    %127 = arith.addf %126, %125 : vector<2x32xf32>
    %128 = arith.divf %126, %127 : vector<2x32xf32>
    %129 = math.tanh %123 : vector<2x32xf32>
    %130 = arith.mulf %128, %129 : vector<2x32xf32>
    %131 = arith.addf %130, %114 : vector<2x32xf32>
    %132 = arith.negf %120 : vector<2x32xf32>
    %133 = math.exp %132 : vector<2x32xf32>
    %cst_62 = arith.constant 1.000000e+00 : f32
    %134 = vector.broadcast %cst_62 : f32 to vector<2x32xf32>
    %135 = arith.addf %134, %133 : vector<2x32xf32>
    %136 = arith.divf %134, %135 : vector<2x32xf32>
    %137 = math.tanh %131 : vector<2x32xf32>
    %138 = arith.mulf %136, %137 : vector<2x32xf32>
    %c0_63 = arith.constant 0 : index
    %c0_64 = arith.constant 0 : index
    %139 = vector.load %arg12[%c0_63, %c0_64] : memref<32x24xf32, #tpu.memory_space<vmem>>, vector<32x24xf32>
    %cst_65 = arith.constant dense<0.000000e+00> : vector<2x24xf32>
    %140 = tpu.matmul %138, %139, %cst_65 {dimension_numbers = #tpu.dot_dimension_numbers<[1], [0], [0], [1], [0, 0, 1, 1], [], []>} : vector<2x32xf32>, vector<32x24xf32>, vector<2x24xf32> -> vector<2x24xf32>
    %c0_66 = arith.constant 0 : index
    %c0_67 = arith.constant 0 : index
    %141 = vector.load %arg13[%c0_66, %c0_67] : memref<1x24xf32, #tpu.memory_space<vmem>>, vector<1x24xf32>
    %142 = vector.broadcast %141 : vector<1x24xf32> to vector<2x24xf32>
    %143 = arith.addf %140, %142 : vector<2x24xf32>
    %144 = math.tanh %143 : vector<2x24xf32>
    %c0_68 = arith.constant 0 : index
    %c0_69 = arith.constant 0 : index
    %145 = vector.load %arg14[%c0_68, %c0_69] : memref<24x5xf32, #tpu.memory_space<vmem>>, vector<24x5xf32>
    %cst_70 = arith.constant dense<0.000000e+00> : vector<2x5xf32>
    %146 = tpu.matmul %144, %145, %cst_70 {dimension_numbers = #tpu.dot_dimension_numbers<[1], [0], [0], [1], [0, 0, 1, 1], [], []>} : vector<2x24xf32>, vector<24x5xf32>, vector<2x5xf32> -> vector<2x5xf32>
    %c0_71 = arith.constant 0 : index
    %c0_72 = arith.constant 0 : index
    %147 = vector.load %arg15[%c0_71, %c0_72] : memref<1x5xf32, #tpu.memory_space<vmem>>, vector<1x5xf32>
    %148 = vector.broadcast %147 : vector<1x5xf32> to vector<2x5xf32>
    %149 = arith.addf %146, %148 : vector<2x5xf32>
    %c0_73 = arith.constant 0 : index
    %c0_74 = arith.constant 0 : index
    %150 = vector.load %arg16[%c0_73, %c0_74] : memref<2x5xf32, #tpu.memory_space<vmem>>, vector<2x5xf32>
    tpu.vector_store %arg16[%c0_73, %c0_74], %149 {strides = array<i32>} : memref<2x5xf32, #tpu.memory_space<vmem>>, vector<2x5xf32>,
    return
  }
}

</mosaic_0001>

<bundles_post_ra>
// kernel: tpu_custom_call.1
= control target key start
LH: loop header
LB: loop body
LE: loop exit
PB: predicated region body
PF: predicated region fallthrough
CT: control target
= control target key end

     0   :  { %s2275_s0 = inlined_call_operand.hbm [shape: f32[16,16], index: 0, kind: input, shape index: {}]   ;;  %s2276_s1 = inlined_call_operand.hbm [shape: f32[16,32], index: 1, kind: input, shape index: {}]   ;;  %s2277_s2 = inlined_call_operand.hbm [shape: f32[16,32], index: 2, kind: input, shape index: {}]   ;;  %s2278_s3 = inlined_call_operand.hbm [shape: f32[16,32], index: 3, kind: input, shape index: {}]   ;;  %s2279_s4 = inlined_call_operand.vmem [shape: f32[32,32], index: 4, kind: input, shape index: {}]   ;;  %s2280_s5 = inlined_call_operand.vmem [shape: f32[32,32], index: 5, kind: input, shape index: {}]   ;;  %s2281_s6 = inlined_call_operand.vmem [shape: f32[32,32], index: 6, kind: input, shape index: {}]   ;;  %s2282_s7 = inlined_call_operand.vmem [shape: f32[1,32], index: 7, kind: input, shape index: {}]   ;;  %s2283_s8 = inlined_call_operand.hbm [shape: f32[1,32], index: 8, kind: input, shape index: {}]   ;;  %s2284_s9 = inlined_call_operand.hbm [shape: f32[1,32], index: 9, kind: input, shape index: {}]   ;;  %s2285_s10 = inlined_call_operand.hbm [shape: f32[32,32], index: 10, kind: input, shape index: {}]   ;;  %s2286_s11 = inlined_call_operand.hbm [shape: f32[1,32], index: 11, kind: input, shape index: {}]   ;;  %s2287_s12 = inlined_call_operand.vmem [shape: f32[32,24], index: 12, kind: input, shape index: {}]   ;;  %s2288_s13 = inlined_call_operand.vmem [shape: f32[1,24], index: 13, kind: input, shape index: {}]   ;;  %s2289_s14 = inlined_call_operand.vmem [shape: f32[24,5], index: 14, kind: input, shape index: {}]   ;;  %s2290_s15 = inlined_call_operand.vmem [shape: f32[1,5], index: 15, kind: input, shape index: {}]   ;;  %s2291_s16 = inlined_call_operand.hbm [shape: f32[2,5], index: 16, kind: output, shape index: {}]  }
   0x1   :  { %2293 = sst [smem:[#allocation23_spill]] %s2275_s0 }
   0x2   :  { %21 = vsyncpa [#allocation3], 0 }
   0x3   :  { %22 = vsyncpa [#allocation6], 0 }
   0x4   :  { %23 = vsyncpa [#allocation9], 0 }
   0x5   :  { %24 = vsyncpa [#allocation12], 0 }
   0x6   :  { %25 = vsyncpa [#allocation15], 0 }
   0x7   :  { %26 = vsyncpa [#allocation4], 0  ;;  %s1866_s21 = smov [#allocation5]   ;;  %s1867_s23 = smov [#allocation8]  }
   0x8   :  { %s44_s22 = sshll.u32 %s1866_s21, 4  ;;  %s68_s24 = sshll.u32 %s1867_s23, 4  ;;  %s45_s22 = int_to_ptr.vmem [resolvable:$true] %s44_s22  ;;  %s1965_s24 = int_to_ptr.vmem [resolvable:$true] %s68_s24 }
   0x9   :  { %s1656_s27 = scalar_lea.hbm %s2276_s1, 256 }
   0xa   :  { %p1657_p0 = scmp.ne.s32.totalorder %s2276_s1, %s1656_s27  ;;  %p1660_p1 = scmp.lt.u32.totalorder %s1656_s27, %s2276_s1 }
   0xc   :  { %p1662_p2 = pnand %p1660_p1, %p1657_p0 }
   0xe   :  { %1665 = shalt.err (!%p1662_p2)
}
   0xf   :  { %s1666_s17 = scalar_lea.vmem %s45_s22, 256  ;;  %p1671_p4 = scmp.lt.s32.totalorder %s45_s22, %s45_s22 }
  0x10   :  { %p1667_p3 = scmp.ne.s32.totalorder %s45_s22, %s1666_s17  ;;  %p1672_p5 = scmp.lt.s32.totalorder %s1666_s17, %s1666_s17 }
  0x12   :  { %p1673_p6 = por %p1672_p5, %p1671_p4 }
  0x14   :  { %p1674_p7 = pnand %p1673_p6, %p1667_p3 }
  0x16   :  { %1677 = shalt.err (!%p1674_p7)
}
  0x17   :  { %s1868_s18 = smov 128   ;;  %s1869_s19 = smov 8  }
  0x18   :  { %50 = dma.hbm_to_vmem [thread:$0]  %s2276_s1, 256, %s45_s22, [#allocation6], %s1868_s18, %s1868_s18, %s1869_s19  }
  0x19   :  { %s1678_s26 = scalar_lea.hbm %s2278_s3, 256 }
  0x1a   :  { %p1679_p8 = scmp.ne.s32.totalorder %s2278_s3, %s1678_s26  ;;  %p1682_p9 = scmp.lt.u32.totalorder %s1678_s26, %s2278_s3 }
  0x1c   :  { %p1684_p10 = pnand %p1682_p9, %p1679_p8 }
  0x1e   :  { %1687 = shalt.err (!%p1684_p10)
}
  0x1f   :  { %s1688_s0 = scalar_lea.vmem %s1965_s24, 256  ;;  %p1693_p12 = scmp.lt.s32.totalorder %s1965_s24, %s1965_s24 }
  0x20   :  { %p1689_p11 = scmp.ne.s32.totalorder %s1965_s24, %s1688_s0  ;;  %p1694_p13 = scmp.lt.s32.totalorder %s1688_s0, %s1688_s0 }
  0x22   :  { %p1695_p0 = por %p1694_p13, %p1693_p12 }
  0x24   :  { %p1696_p1 = pnand %p1695_p0, %p1689_p11 }
  0x26   :  { %1699 = shalt.err (!%p1696_p1)
}
  0x27   :  { %74 = dma.hbm_to_vmem [thread:$0]  %s2278_s3, 256, %s1965_s24, [#allocation9], %s1868_s18, %s1868_s18, %s1869_s19  }
  0x28   :  { %s1870_s17 = smov [#allocation11]   ;;  %s1871_s21 = smov [#allocation2]  }
  0x29   :  { %s99_s20 = sshll.u32 %s1870_s17, 4  ;;  %s32_s23 = sshll.u32 %s1871_s21, 4  ;;  %s100_s20 = int_to_ptr.vmem [resolvable:$true] %s99_s20  ;;  %s2002_s23 = int_to_ptr.vmem [resolvable:$true] %s32_s23 }
  0x2a   :  { %s1700_s27 = scalar_lea.hbm %s2284_s9, 16 }
  0x2b   :  { %p1701_p2 = scmp.ne.s32.totalorder %s2284_s9, %s1700_s27  ;;  %p1704_p3 = scmp.lt.u32.totalorder %s1700_s27, %s2284_s9 }
  0x2d   :  { %p1706_p4 = pnand %p1704_p3, %p1701_p2 }
  0x2f   :  { %1709 = shalt.err (!%p1706_p4)
}
  0x30   :  { %s1710_s3 = scalar_lea.vmem %s100_s20, 16  ;;  %s1714_s24 = scalar_lea.vmem %s100_s20, 32 }
  0x31   :  { %p1711_p5 = scmp.ne.s32.totalorder %s100_s20, %s1710_s3  ;;  %p1715_p6 = scmp.lt.s32.totalorder %s100_s20, %s100_s20 }
  0x32   :  { %p1716_p7 = scmp.lt.s32.totalorder %s1714_s24, %s1710_s3 }
  0x34   :  { %p1717_p8 = por %p1716_p7, %p1715_p6 }
  0x36   :  { %p1718_p9 = pnand %p1717_p8, %p1711_p5 }
  0x38   :  { %1721 = shalt.err (!%p1718_p9)
}
  0x39   :  { %102 = dma.hbm_to_vmem [thread:$0]  %s2284_s9, 16, %s100_s20, [#allocation12]  }
  0x3a   :  { %s2294_s25 = sld [smem:[#allocation23_spill]] }
  0x40   :  { %s1722_s26 = scalar_lea.hbm %s2294_s25, 256 }
  0x41   :  { %p1723_p10 = scmp.ne.s32.totalorder %s2294_s25, %s1722_s26  ;;  %p1726_p11 = scmp.lt.u32.totalorder %s1722_s26, %s2294_s25 }
  0x43   :  { %p1728_p12 = pnand %p1726_p11, %p1723_p10 }
  0x45   :  { %1731 = shalt.err (!%p1728_p12)
}
  0x46   :  { %s1732_s0 = scalar_lea.vmem %s2002_s23, 256  ;;  %p1737_p0 = scmp.lt.s32.totalorder %s2002_s23, %s2002_s23 }
  0x47   :  { %p1733_p13 = scmp.ne.s32.totalorder %s2002_s23, %s1732_s0  ;;  %p1738_p1 = scmp.lt.s32.totalorder %s1732_s0, %s1732_s0 }
  0x49   :  { %p1739_p2 = por %p1738_p1, %p1737_p0 }
  0x4b   :  { %p1740_p3 = pnand %p1739_p2, %p1733_p13 }
  0x4d   :  { %1743 = shalt.err (!%p1740_p3)
}
  0x4e   :  { %38 = dma.hbm_to_vmem [thread:$0]  %s2294_s25, 256, %s2002_s23, [#allocation3], %s1868_s18, %s1868_s18, %s1869_s19  }
  0x4f   :  { %s1872_s3 = smov [#allocation7]   ;;  %s1873_s1 = smov [#allocation10]  }
  0x50   :  { %s56_s24 = sshll.u32 %s1872_s3, 4  ;;  %s89_s22 = sshll.u32 %s1873_s1, 4  ;;  %s57_s24 = int_to_ptr.vmem [resolvable:$true] %s56_s24  ;;  %s90_s22 = int_to_ptr.vmem [resolvable:$true] %s89_s22 }
  0x51   :  { %s1744_s26 = scalar_lea.hbm %s2277_s2, 256 }
  0x52   :  { %p1745_p4 = scmp.ne.s32.totalorder %s2277_s2, %s1744_s26  ;;  %p1748_p5 = scmp.lt.u32.totalorder %s1744_s26, %s2277_s2 }
  0x54   :  { %p1750_p6 = pnand %p1748_p5, %p1745_p4 }
  0x56   :  { %1753 = shalt.err (!%p1750_p6)
}
  0x57   :  { %s1754_s23 = scalar_lea.vmem %s57_s24, 256  ;;  %p1759_p8 = scmp.lt.s32.totalorder %s57_s24, %s57_s24 }
  0x58   :  { %p1755_p7 = scmp.ne.s32.totalorder %s57_s24, %s1754_s23  ;;  %p1760_p9 = scmp.lt.s32.totalorder %s1754_s23, %s1754_s23 }
  0x5a   :  { %p1761_p10 = por %p1760_p9, %p1759_p8 }
  0x5c   :  { %p1762_p11 = pnand %p1761_p10, %p1755_p7 }
  0x5e   :  { %1765 = shalt.err (!%p1762_p11)
}
  0x5f   :  { %62 = dma.hbm_to_vmem [thread:$0]  %s2277_s2, 256, %s57_s24, [#allocation6], %s1868_s18, %s1868_s18, %s1869_s19  }
  0x60   :  { %s1766_s3 = scalar_lea.hbm %s2283_s8, 16 }
  0x61   :  { %p1767_p12 = scmp.ne.s32.totalorder %s2283_s8, %s1766_s3  ;;  %p1770_p13 = scmp.lt.u32.totalorder %s1766_s3, %s2283_s8 }
  0x63   :  { %p1772_p0 = pnand %p1770_p13, %p1767_p12 }
  0x65   :  { %1775 = shalt.err (!%p1772_p0)
}
  0x66   :  { %s1776_s28 = scalar_lea.vmem %s90_s22, 16  ;;  %s1780_s27 = scalar_lea.vmem %s90_s22, 32 }
  0x67   :  { %p1777_p1 = scmp.ne.s32.totalorder %s90_s22, %s1776_s28  ;;  %p1781_p2 = scmp.lt.s32.totalorder %s90_s22, %s90_s22 }
  0x68   :  { %p1782_p3 = scmp.lt.s32.totalorder %s1780_s27, %s1776_s28 }
  0x6a   :  { %p1783_p4 = por %p1782_p3, %p1781_p2 }
  0x6c   :  { %p1784_p5 = pnand %p1783_p4, %p1777_p1 }
  0x6e   :  { %1787 = shalt.err (!%p1784_p5)
}
  0x6f   :  { %92 = dma.hbm_to_vmem [thread:$0]  %s2283_s8, 16, %s90_s22, [#allocation9]  }
  0x70   :  { %s1874_s29 = smov [#allocation13]   ;;  %s1875_s23 = smov [#allocation14]  }
  0x71   :  { %s108_s30 = sshll.u32 %s1874_s29, 4  ;;  %s121_s25 = sshll.u32 %s1875_s23, 4  ;;  %s109_s30 = int_to_ptr.vmem [resolvable:$true] %s108_s30  ;;  %s122_s25 = int_to_ptr.vmem [resolvable:$true] %s121_s25 }
  0x72   :  { %s1788_s20 = scalar_lea.hbm %s2285_s10, 512 }
  0x73   :  { %p1789_p6 = scmp.ne.s32.totalorder %s2285_s10, %s1788_s20  ;;  %p1792_p7 = scmp.lt.u32.totalorder %s1788_s20, %s2285_s10 }
  0x75   :  { %p1794_p8 = pnand %p1792_p7, %p1789_p6 }
  0x77   :  { %1797 = shalt.err (!%p1794_p8)
}
  0x78   :  { %s1798_s8 = scalar_lea.vmem %s109_s30, 512  ;;  %p1803_p10 = scmp.lt.s32.totalorder %s109_s30, %s109_s30 }
  0x79   :  { %p1799_p9 = scmp.ne.s32.totalorder %s109_s30, %s1798_s8  ;;  %p1804_p11 = scmp.lt.s32.totalorder %s1798_s8, %s1798_s8 }
  0x7b   :  { %p1805_p12 = por %p1804_p11, %p1803_p10 }
  0x7d   :  { %p1806_p13 = pnand %p1805_p12, %p1799_p9 }
  0x7f   :  { %1809 = shalt.err (!%p1806_p13)
}
  0x80   :  { %114 = dma.hbm_to_vmem [thread:$0]  %s2285_s10, 512, %s109_s30, [#allocation12], %s1868_s18, %s1868_s18, %s1869_s19  }
  0x81   :  { %s1810_s2 = scalar_lea.hbm %s2286_s11, 16 }
  0x82   :  { %p1811_p0 = scmp.ne.s32.totalorder %s2286_s11, %s1810_s2  ;;  %p1814_p1 = scmp.lt.u32.totalorder %s1810_s2, %s2286_s11 }
  0x84   :  { %p1816_p2 = pnand %p1814_p1, %p1811_p0 }
  0x86   :  { %1819 = shalt.err (!%p1816_p2)
}
  0x87   :  { %s1820_s9 = scalar_lea.vmem %s122_s25, 16  ;;  %s1824_s20 = scalar_lea.vmem %s122_s25, 32 }
  0x88   :  { %p1821_p3 = scmp.ne.s32.totalorder %s122_s25, %s1820_s9  ;;  %p1825_p4 = scmp.lt.s32.totalorder %s122_s25, %s122_s25 }
  0x89   :  { %p1826_p5 = scmp.lt.s32.totalorder %s1824_s20, %s1820_s9 }
  0x8b   :  { %p1827_p6 = por %p1826_p5, %p1825_p4 }
  0x8d   :  { %p1828_p7 = pnand %p1827_p6, %p1821_p3 }
  0x8f   :  { %1831 = shalt.err (!%p1828_p7)
}
  0x90   :  { %124 = dma.hbm_to_vmem [thread:$0]  %s2286_s11, 16, %s122_s25, [#allocation15]  }
  0x91   :  { %1854 = dma.done.wait [#allocation3], 256  }
  0x92   :  { %1855 = vsyncadd [#allocation3], 4294967040 }
  0x93   :  { %1856 = dma.done.wait [#allocation6], 512  }
  0x94   :  { %1857 = vsyncadd [#allocation6], 4294966784 }
  0x95   :  { %1858 = dma.done.wait [#allocation9], 272  }
  0x96   :  { %1859 = vsyncadd [#allocation9], 4294967024 }
  0x97   :  { %1860 = dma.done.wait [#allocation12], 528  }
  0x98   :  { %1861 = vsyncadd [#allocation12], 4294966768 }
  0x99   :  { %1862 = dma.done.wait [#allocation15], 16  }
  0x9a   :  { %1863 = vsyncadd [#allocation15], 4294967280  ;;  %vm161_vm0 = vcmask 130048   ;;  %v159_v0 = vld [vmem:[#allocation5] sm:$0xff]  ;;  %v160_v1 = vld [vmem:[#allocation5 + $0x8] sm:$0xff]  ;;  %v1876_v14 = vmov 0.0|0.0  }
  0x9b   :  { %v157_v2 = vld [vmem:[#allocation2] sm:$0xff]  ;;  %v1527_v3 = vpack.c.bf16 %v160_v1, %v159_v0  ;;  %v244_v5 = vld [vmem:[#allocation7 + $0x8] sm:$0xff]  ;;  %v320_v7 = vld [vmem:[#allocation8] sm:$0xff]  ;;  %vm1877_vm1 = vmmov 0   ;;  %v1878_v20 = vmov 0.0   ;;  %vm451_vm2 = vcmask 261120  }
  0x9c   :  { %1402 = vmatprep.mubr.msk.f32.mxu0 %vm161_vm0, %v157_v2  ;;  %v243_v4 = vld [vmem:[#allocation7] sm:$0xff]  ;;  %1409 = vmatprep.mubr.msk.f32.mxu1 %vm161_vm0, %v157_v2  ;;  %v321_v8 = vld [vmem:[#allocation8 + $0x8] sm:$0xff]  ;;  %v158_v10 = vld [vmem:[#allocation2 + $0x8] sm:$0xff]  ;;  %vm1212_vm3 = vcmask 195584   ;;  %s1879_s29 = smov [#allocation16]   ;;  %vm1286_vm4 = vcmask 33792  }
  0x9d   :  { %v1531_v6 = vpack.c.bf16 %v244_v5, %v243_v4  ;;  %1528 = vmatprep.subr.bf16.mxu0 %v1527_v3  ;;  %v1535_v9 = vpack.c.bf16 %v321_v8, %v320_v7  ;;  %v440_v11 = vld [vmem:[#allocation13] sm:$0xff]  ;;  %v441_v12 = vld [vmem:[#allocation13 + $0x8] sm:$0xff]  ;;  %v442_v13 = vld [vmem:[#allocation13 + $0x10] sm:$0xff]  ;;  %s1294_s23 = sshll.u32 %s1879_s29, 4  ;;  %s1295_s23 = int_to_ptr.vmem [resolvable:$true] %s1294_s23 }
  0x9e   :  { %1530 = vmatpush3.bf16.msra.mxu0 %v1527_v3  ;;  %v2097_v15 = vpack.c.bf16 %v441_v12, %v440_v11  ;;  %v443_v16 = vld [vmem:[#allocation13 + $0x18] sm:$0xff]  ;;  %v540_v18 = vld [vmem:[%s2279_s4 + $0x8] sm:$0xff]  ;;  %v541_v22 = vld [vmem:[%s2279_s4 + $0x10] sm:$0xff]  ;;  %p1837_p9 = scmp.lt.s32.totalorder %s1295_s23, %s1295_s23 }
  0x9f   :  { %1532 = vmatprep.subr.bf16.mxu1 %v1531_v6  ;;  %1536 = vmatprep.subr.bf16.mxu0 %v1535_v9  ;;  %v539_v17 = vld [vmem:[%s2279_s4] sm:$0xff]  ;;  %v2113_v21 = vpack.c.bf16 %v443_v16, %v442_v13  ;;  %v542_v23 = vld [vmem:[%s2279_s4 + $0x18] sm:$0xff]  ;;  %v618_v50 = vld [vmem:[%s2280_s5 + $0x8] sm:$0xff] }
  0xa0   :  { %1534 = vmatpush3.bf16.msra.mxu1 %v1531_v6  ;;  %v2106_v19 = vpack.c.bf16 %v540_v18, %v539_v17  ;;  %v2126_v24 = vpack.c.bf16 %v542_v23, %v541_v22  ;;  %v1313_v25 = vld [vmem:[%s2282_s7] ss:$0 sm:$0xff]  ;;  %v1315_v34 = vld [vmem:[#allocation11] ss:$0 sm:$0xff]  ;;  %v619_v54 = vld [vmem:[%s2280_s5 + $0x10] sm:$0xff] }
  0xa1   :  { %1403 = vmatmul.mubr.msk.f32.vlgmr.msra.gmra.mrb[0].mxu0 %vm161_vm0, %v158_v10  ;;  %1539 = vmatprep.subr.bf16.mxu1 %v1876_v14  ;;  %v1314_v26 = vld [vmem:[#allocation10] ss:$0 sm:$0xff]  ;;  %v620_v56 = vld [vmem:[%s2280_s5 + $0x18] sm:$0xff]  ;;  %v693_v58 = vld [vmem:[%s2281_s6 + $0x8] sm:$0xff] }
  0xa2   :  { %1538 = vmatpush3.bf16.msra.mxu0 %v1535_v9  ;;  %1416 = vmatprep.mubr.msk.f32.mxu0 %vm161_vm0, %v157_v2  ;;  %v617_v49 = vld [vmem:[%s2280_s5] sm:$0xff]  ;;  %v2164_v60 = vpack.c.bf16 %v620_v56, %v619_v54  ;;  %v694_v63 = vld [vmem:[%s2281_s6 + $0x10] sm:$0xff]  ;;  %v695_v0 = vld [vmem:[%s2281_s6 + $0x18] sm:$0xff] }
  0xa3   :  { %1410 = vmatmul.mubr.msk.f32.vlgmr.msra.gmra.mrb[0].mxu1 %vm161_vm0, %v158_v10  ;;  %1545 = vmatprep.subr.bf16.mxu0 %v1876_v14  ;;  %v2148_v53 = vpack.c.bf16 %v618_v50, %v617_v49  ;;  %v692_v57 = vld [vmem:[%s2281_s6] sm:$0xff]  ;;  %v2180_v1 = vpack.c.bf16 %v695_v0, %v694_v63 }
  0xa4   :  { %1427 = vmatprep.mubr.msk.f32.mxu1 %vm1877_vm1, %v1878_v20  ;;  %1541 = vmatpush3.bf16.msra.mxu1 %v2097_v15  ;;  %v2166_v61 = vpack.c.bf16 %v693_v58, %v692_v57  ;;  %v2202_v2 = vld [vmem:[#allocation14] ss:$0 sm:$0xff] }
  0xa5   :  { %1417 = vmatmul.mubr.msk.f32.vlgmr.msra.gmra.mrb[2].mxu0 %vm161_vm0, %v158_v10  ;;  %1542 = vmatprep.subr.bf16.mxu1 %v1876_v14 }
  0xa6   :  { %1438 = vmatprep.mubr.msk.f32.mxu0 %vm1877_vm1, %v1878_v20  ;;  %1547 = vmatpush3.bf16.msra.mxu0 %v2106_v19 }
  0xa7   :  { %1548 = vmatprep.subr.bf16.mxu0 %v1876_v14 }
  0xa8   :  { %1544 = vmatpush3.bf16.msra.mxu1 %v2113_v21 }
  0xa9   :  { %1551 = vmatprep.subr.bf16.mxu1 %v1876_v14 }
  0xaa   :  { %1550 = vmatpush3.bf16.msra.mxu0 %v2126_v24 }
  0xab   :  { %1557 = vmatprep.subr.bf16.mxu0 %v1876_v14 }
 0x174   :  { %v1404_v27 = vpop.f32.mrb[0].mxu0 }
 0x175   :  { %v2133_v28 = vadd.f32 %v1404_v27, %v1313_v25  ;;  %v234_v29 = vpop.f32.mrb[1].mxu0 }
 0x176   :  { %v1411_v30 = vpop.f32.mrb[0].mxu1  ;;  %v404_v31 = vadd.f32 %v1313_v25, %v234_v29 }
 0x177   :  { %v2135_v32 = vadd.f32 %v1411_v30, %v1314_v26  ;;  %v311_v33 = vpop.f32.mrb[1].mxu1 }
 0x178   :  { %v1316_v35 = vmul.f32 -1.442695, %v404_v31  ;;  %v1418_v36 = vpop.f32.mrb[2].mxu0  ;;  %v412_v37 = vadd.f32 %v1314_v26, %v311_v33 }
 0x179   :  { %v2137_v38 = vadd.f32 %v1418_v36, %v1315_v34  ;;  %v388_v39 = vpop.f32.mrb[3].mxu0 }
 0x17a   :  { %1610 = vpow2.f32 %v1316_v35  ;;  %v1317_v40 = vmul.f32 -1.442695, %v412_v37  ;;  %v420_v41 = vadd.f32 %v1315_v34, %v388_v39 }
 0x17c   :  { %1612 = vpow2.f32 %v1317_v40 }
 0x17d   :  { %1614 = vtanh.f32 %v420_v41 }
 0x184   :  { %v1611_v42 = vpop.eup %1610 }
 0x185   :  { %v424_v43 = vadd.f32 1.0, %v1611_v42  ;;  %v1116_v42 = vld [vmem:[%s2287_s12] sm:$0xff] }
 0x186   :  { %v1613_v44 = vpop.eup %1612 }
 0x187   :  { %1616 = vrcp.f32 %v424_v43  ;;  %v432_v45 = vadd.f32 1.0, %v1613_v44  ;;  %v1615_v46 = vpop.eup %1614  ;;  %v1117_v43 = vld [vmem:[%s2287_s12 + $0x8] sm:$0xff]  ;;  %v1118_v44 = vld [vmem:[%s2287_s12 + $0x10] sm:$0xff] }
 0x189   :  { %1618 = vrcp.f32 %v432_v45  ;;  %v1588_v45 = vpack.c.bf16 %v1117_v43, %v1116_v42 }
 0x191   :  { %v1617_v47 = vpop.eup %1616 }
 0x192   :  { %v2139_v48 = vmul.f32 %v1617_v47, %v1615_v46  ;;  %v1119_v46 = vld [vmem:[%s2287_s12 + $0x18] sm:$0xff] }
 0x193   :  { %v1619_v51 = vpop.eup %1618  ;;  %v1591_v47 = vpack.c.bf16 %v1119_v46, %v1118_v44 }
 0x194   :  { %1620 = vtanh.f32 %v2139_v48 }
 0x19e   :  { %v1621_v52 = vpop.eup %1620 }
 0x19f   :  { %v436_v55 = vmul.f32 %v1621_v52, %v1619_v51 }
 0x1a1   :  { %1428 = vmatmul.mubr.msk.f32.vlgmr.msra.gmra.mrb[2].mxu1 %vm451_vm2, %v436_v55  ;;  %v532_v59 = vrot.slane %v436_v55, 4 }
 0x1a2   :  { %1553 = vmatpush3.bf16.msra.mxu1 %v2148_v53  ;;  %1449 = vmatprep.mubr.msk.f32.mxu1 %vm1877_vm1, %v1878_v20 }
 0x1a3   :  { %1554 = vmatprep.subr.bf16.mxu1 %v1876_v14  ;;  %v534_v62 = vadd.f32 %v532_v59, %v436_v55 }
 0x1a5   :  { %1439 = vmatmul.mubr.msk.f32.vlgmr.msra.gmra.mrb[4].mxu0 %vm451_vm2, %v534_v62 }
 0x1a6   :  { %1556 = vmatpush3.bf16.msra.mxu1 %v2164_v60  ;;  %1559 = vmatpush3.bf16.msra.mxu0 %v2166_v61 }
 0x1a7   :  { %1560 = vmatprep.subr.bf16.mxu0 %v1876_v14  ;;  %1460 = vmatprep.mubr.msk.f32.mxu0 %vm1877_vm1, %v1878_v20 }
 0x1a8   :  { %1563 = vmatprep.subr.bf16.mxu1 %v1876_v14 }
 0x1a9   :  { %1450 = vmatmul.mubr.msk.f32.vlgmr.msra.gmra.mrb[4].mxu1 %vm451_vm2, %v534_v62 }
 0x1aa   :  { %1562 = vmatpush3.bf16.msra.mxu0 %v2180_v1  ;;  %1565 = vmatpush3.bf16.msra.mxu1 %v2097_v15 }
 0x1ab   :  { %1566 = vmatprep.subr.bf16.mxu1 %v1876_v14  ;;  %1569 = vmatprep.subr.bf16.mxu0 %v1876_v14 }
 0x1ac   :  { %1471 = vmatprep.mubr.msk.f32.mxu1 %vm1877_vm1, %v1878_v20 }
 0x1ad   :  { %1461 = vmatmul.mubr.msk.f32.vlgmr.msra.gmra.mrb[6].mxu0 %vm451_vm2, %v534_v62 }
 0x1ae   :  { %1568 = vmatpush3.bf16.msra.mxu1 %v2113_v21  ;;  %1571 = vmatpush3.bf16.msra.mxu0 %v2106_v19 }
 0x1af   :  { %1572 = vmatprep.subr.bf16.mxu0 %v1876_v14  ;;  %1575 = vmatprep.subr.bf16.mxu1 %v1876_v14 }
 0x1b0   :  { %1482 = vmatprep.mubr.msk.f32.mxu0 %vm1877_vm1, %v1878_v20 }
 0x1b2   :  { %1574 = vmatpush3.bf16.msra.mxu0 %v2126_v24 }
 0x1b3   :  { %1581 = vmatprep.subr.bf16.mxu0 %v1876_v14 }
 0x274   :  { %v521_v3 = vpop.f32.mrb[2].mxu1 }
 0x275   :  { %v522_v4 = vadd.f32 %v2202_v2, %v521_v3  ;;  %v1429_v5 = vpop.f32.mrb[3].mxu1 }
 0x277   :  { %v1320_v6 = vmul.f32 -1.442695, %v522_v4 }
 0x278   :  { %v612_v7 = vpop.f32.mrb[4].mxu0 }
 0x279   :  { %1622 = vpow2.f32 %v1320_v6  ;;  %v616_v8 = vadd.f32 %v612_v7, %v2133_v28  ;;  %v1440_v9 = vpop.f32.mrb[5].mxu0 }
 0x27b   :  { %v1324_v10 = vmul.f32 -1.442695, %v616_v8 }
 0x27c   :  { %v687_v11 = vpop.f32.mrb[4].mxu1 }
 0x27d   :  { %1624 = vpow2.f32 %v1324_v10  ;;  %v1451_v12 = vpop.f32.mrb[5].mxu1  ;;  %v691_v13 = vadd.f32 %v687_v11, %v2135_v32 }
 0x27f   :  { %v1325_v18 = vmul.f32 -1.442695, %v691_v13 }
 0x280   :  { %v762_v15 = vpop.f32.mrb[6].mxu0 }
 0x281   :  { %v1462_v16 = vpop.f32.mrb[7].mxu0  ;;  %v766_v21 = vadd.f32 %v762_v15, %v2137_v38 }
 0x283   :  { %v1623_v17 = vpop.eup %1622 }
 0x284   :  { %v528_v19 = vadd.f32 1.0, %v1623_v17 }
 0x286   :  { %1626 = vrcp.f32 %v528_v19  ;;  %v1203_v19 = vld [vmem:[%s2289_s14 + $0x8] sm:$0xff] }
 0x287   :  { %v1625_v22 = vpop.eup %1624  ;;  %1628 = vpow2.f32 %v1325_v18  ;;  %v1202_v18 = vld [vmem:[%s2289_s14] sm:$0xff] }
 0x288   :  { %v770_v23 = vadd.f32 1.0, %v1625_v22  ;;  %1630 = vtanh.f32 %v766_v21  ;;  %v1594_v21 = vpack.c.bf16 %v1203_v19, %v1202_v18  ;;  %v1204_v22 = vld [vmem:[%s2289_s14 + $0x10] sm:$0xff] }
 0x28a   :  { %1632 = vrcp.f32 %v770_v23  ;;  %v1333_v23 = vld [vmem:[%s2288_s13] ss:$0 sm:$0xff]  ;;  %s1832_s13 = scalar_lea.vmem %s1295_s23, 32 }
 0x28b   :  { %p1833_p8 = scmp.ne.s32.totalorder %s1295_s23, %s1832_s13  ;;  %p1838_p10 = scmp.lt.s32.totalorder %s1832_s13, %s1832_s13 }
 0x28d   :  { %p1839_p11 = por %p1838_p10, %p1837_p9 }
 0x28f   :  { %p1840_p12 = pnand %p1839_p11, %p1833_p8 }
 0x290   :  { %v1627_v24 = vpop.eup %1626 }
 0x291   :  { %v1629_v25 = vpop.eup %1628  ;;  %v531_v26 = vmul.f32 %v1627_v24, %v2139_v48 }
 0x292   :  { %v1631_v27 = vpop.eup %1630  ;;  %v779_v31 = vadd.f32 1.0, %v1629_v25 }
 0x293   :  { %v536_v29 = vrot.slane %v531_v26, 4 }
 0x294   :  { %v1633_v30 = vpop.eup %1632  ;;  %1634 = vrcp.f32 %v779_v31 }
 0x295   :  { %v538_v33 = vadd.f32 %v536_v29, %v531_v26  ;;  %v774_v34 = vmul.f32 %v1633_v30, %v1631_v27 }
 0x297   :  { %v775_v35 = vadd.f32 %v774_v34, %v538_v33 }
 0x299   :  { %1636 = vtanh.f32 %v775_v35 }
 0x29e   :  { %v1635_v36 = vpop.eup %1634 }
 0x2a3   :  { %v1637_v37 = vpop.eup %1636 }
 0x2a4   :  { %v783_v39 = vmul.f32 %v1637_v37, %v1635_v36 }
 0x2a6   :  { %1472 = vmatmul.mubr.msk.f32.vlgmr.msra.gmra.mrb[6].mxu1 %vm451_vm2, %v783_v39  ;;  %v864_v40 = vrot.slane %v783_v39, 2 }
 0x2a7   :  { %1577 = vmatpush3.bf16.msra.mxu1 %v2148_v53  ;;  %1493 = vmatprep.mubr.msk.f32.mxu1 %vm1877_vm1, %v1878_v20 }
 0x2a8   :  { %1578 = vmatprep.subr.bf16.mxu1 %v1876_v14  ;;  %v866_v41 = vadd.f32 %v864_v40, %v783_v39 }
 0x2aa   :  { %1483 = vmatmul.mubr.msk.f32.vlgmr.msra.gmra.mrb[8].mxu0 %vm451_vm2, %v866_v41 }
 0x2ab   :  { %1580 = vmatpush3.bf16.msra.mxu1 %v2164_v60  ;;  %1583 = vmatpush3.bf16.msra.mxu0 %v2166_v61 }
 0x2ac   :  { %1584 = vmatprep.subr.bf16.mxu0 %v1876_v14  ;;  %1504 = vmatprep.mubr.msk.f32.mxu0 %vm1877_vm1, %v1878_v20 }
 0x2ad   :  { %1587 = vmatprep.subr.bf16.mxu1 %v1876_v14 }
 0x2ae   :  { %1494 = vmatmul.mubr.msk.f32.vlgmr.msra.gmra.mrb[8].mxu1 %vm451_vm2, %v866_v41 }
 0x2af   :  { %1586 = vmatpush3.bf16.msra.mxu0 %v2180_v1  ;;  %1515 = vmatprep.mubr.msk.f32.mxu1 %vm1877_vm1, %v1878_v20 }
 0x2b0   :  { %1593 = vmatprep.subr.bf16.mxu0 %v1876_v14  ;;  %1589 = vmatpush3.bf16.msra.mxu1 %v1588_v45 }
 0x2b1   :  { %1590 = vmatprep.subr.bf16.mxu1 %v1876_v14 }
 0x2b2   :  { %1505 = vmatmul.mubr.msk.f32.vlgmr.msra.gmra.mrb[10].mxu0 %vm451_vm2, %v866_v41 }
 0x2b3   :  { %1524 = vmatprep.mubr.msk.f32.mxu0 %vm1877_vm1, %v1878_v20  ;;  %1595 = vmatpush3.bf16.msra.mxu0 %v1594_v21 }
 0x2b4   :  { %1592 = vmatpush3.bf16.msra.mxu1 %v1591_v47  ;;  %1522 = vmatprep.subr.mxu0 %v1878_v20  ;;  %v1335_v20 = vld [vmem:[%s2290_s15] ss:$0 sm:$0xff] }
 0x2b7   :  { %1523 = vmatpush3.msra.mxu0 %v1204_v22 }
 0x379   :  { %v853_v48 = vpop.f32.mrb[6].mxu1 }
 0x37a   :  { %v854_v49 = vadd.f32 %v2202_v2, %v853_v48  ;;  %v1473_v50 = vpop.f32.mrb[7].mxu1 }
 0x37c   :  { %v1327_v51 = vmul.f32 -1.442695, %v854_v49 }
 0x37d   :  { %v940_v52 = vpop.f32.mrb[8].mxu0 }
 0x37e   :  { %1638 = vpow2.f32 %v1327_v51  ;;  %v945_v53 = vrot.slane %v940_v52, 4  ;;  %v1484_v54 = vpop.f32.mrb[9].mxu0 }
 0x380   :  { %v947_v55 = vadd.f32 %v945_v53, %v2133_v28 }
 0x381   :  { %v1014_v56 = vpop.f32.mrb[8].mxu1 }
 0x382   :  { %v1331_v57 = vmul.f32 -1.442695, %v947_v55  ;;  %v1019_v58 = vrot.slane %v1014_v56, 4  ;;  %v1495_v59 = vpop.f32.mrb[9].mxu1 }
 0x384   :  { %1640 = vpow2.f32 %v1331_v57  ;;  %v1021_v14 = vadd.f32 %v1019_v58, %v2135_v32 }
 0x385   :  { %v1088_v60 = vpop.f32.mrb[10].mxu0 }
 0x386   :  { %v1506_v61 = vpop.f32.mrb[11].mxu0  ;;  %v1093_v63 = vrot.slane %v1088_v60, 4  ;;  %v1332_v1 = vmul.f32 -1.442695, %v1021_v14 }
 0x388   :  { %v1639_v62 = vpop.eup %1638  ;;  %v1095_v2 = vadd.f32 %v1093_v63, %v2137_v38 }
 0x389   :  { %v860_v0 = vadd.f32 1.0, %v1639_v62 }
 0x38b   :  { %1642 = vrcp.f32 %v860_v0 }
 0x38c   :  { %1644 = vpow2.f32 %v1332_v1 }
 0x38d   :  { %1646 = vtanh.f32 %v1095_v2 }
 0x38e   :  { %v1641_v3 = vpop.eup %1640 }
 0x38f   :  { %v1099_v4 = vadd.f32 1.0, %v1641_v3 }
 0x391   :  { %1648 = vrcp.f32 %v1099_v4 }
 0x395   :  { %v1643_v28 = vpop.eup %1642 }
 0x396   :  { %v863_v5 = vmul.f32 %v1643_v28, %v775_v35  ;;  %v1645_v6 = vpop.eup %1644 }
 0x397   :  { %v1647_v8 = vpop.eup %1646  ;;  %v1111_v10 = vadd.f32 1.0, %v1645_v6 }
 0x398   :  { %v868_v7 = vrot.slane %v863_v5, 2 }
 0x399   :  { %1650 = vrcp.f32 %v1111_v10 }
 0x39a   :  { %v870_v9 = vadd.f32 %v868_v7, %v863_v5 }
 0x39b   :  { %v1649_v32 = vpop.eup %1648 }
 0x39c   :  { %v1103_v11 = vmul.f32 %v1649_v32, %v1647_v8  ;;  %v1105_v12 = vrot.slane %v870_v9, 4 }
 0x39e   :  { %v1107_v13 = vadd.f32 %v1105_v12, %v1103_v11 }
 0x3a0   :  { %1652 = vtanh.f32 %v1107_v13 }
 0x3a3   :  { %v1651_v15 = vpop.eup %1650 }
 0x3aa   :  { %v1653_v38 = vpop.eup %1652 }
 0x3ab   :  { %v1115_v16 = vmul.f32 %v1653_v38, %v1651_v15 }
 0x3ad   :  { %v1128_v17 = vrot.slane %v1115_v16, 4 }
 0x3af   :  { %1516 = vmatmul.mubr.msk.f32.vlgmr.msra.gmra.mrb[10].mxu1 %vm451_vm2, %v1128_v17 }
 0x482   :  { %v1197_v24 = vpop.f32.mrb[10].mxu1 }
 0x483   :  { %v1198_v25 = vadd.f32 %v1333_v23, %v1197_v24  ;;  %v1517_v26 = vpop.f32.mrb[11].mxu1 }
 0x485   :  { %1654 = vtanh.f32 %v1198_v25 }
 0x48f   :  { %v1655_v27 = vpop.eup %1654 }
 0x490   :  { %1525 = vmatmul.mubr.msk.f32.vlgmr.msra.gmra.mrb[12].mxu0 %vm1212_vm3, %v1655_v27 }
 0x563   :  { %v1282_v29 = vpop.f32.mrb[12].mxu0 }
 0x564   :  { %v1283_v30 = vadd.f32 %v1335_v20, %v1282_v29  ;;  %v1526_v31 = vpop.f32.mrb[13].mxu0 }
 0x566   :  { %1287 = vst.msk [vmem:[#allocation16] sm:$0x3] %vm1286_vm4, %v1283_v30 }
 0x567   :  { %1843 = shalt.err (!%p1840_p12)
}
 0x568   :  { %s1844_s9 = scalar_lea.hbm %s2291_s16, 32 }
 0x569   :  { %p1845_p13 = scmp.ne.s32.totalorder %s2291_s16, %s1844_s9  ;;  %p1848_p0 = scmp.lt.u32.totalorder %s1844_s9, %s2291_s16 }
 0x56b   :  { %p1850_p1 = pnand %p1848_p0, %p1845_p13 }
 0x56d   :  { %1853 = shalt.err (!%p1850_p1)
}
 0x56e   :  { %1297 = dma.vmem_to_hbm [thread:$0]  %s1295_s23, 32, %s2291_s16, [#allocation4]  }
 0x56f   :  { %1864 = dma.done.wait [#allocation4], 32  }
 0x570   :  { %1865 = vsyncadd [#allocation4], 4294967264 }
 0x571   :  { %1301 = vsyncpa [#allocation3], 1 }
 0x572   :  { %1302 = vsyncpa [#allocation6], 1 }
 0x573   :  { %1303 = vsyncpa [#allocation9], 1 }
 0x574   :  { %1304 = vsyncpa [#allocation12], 1 }
 0x575   :  { %1305 = vsyncpa [#allocation15], 1 }
 0x576   :  { %1306 = vsyncpa [#allocation4], 1 }

</bundles_post_ra>
